<compile_context>
chip_gen: v7x
topology: tpu7x:2x2x1
jax: 0.10.0
libtpu: 0.0.40
codegen_flags: <defaults>
</compile_context>

<pallas_src>
import functools

import jax
import jax.numpy as jnp
from jax.experimental import pallas as pl
from jax.experimental.pallas import tpu as pltpu


def _round_up(x, m):
    return ((x + m - 1) // m) * m


def _generation_tiles():
    """Per-TPU-generation (tm, tn, tk, vmem_limit_bytes) defaults.

    f32 operands are streamed from HBM (cast to bf16 in-kernel), so the tile
    footprints are sized for 4-byte elements:
      v6e : 1024^2 out tile -> ~36 MiB aggregate (needs limit > 32 MiB default)
      v7x :  768^2 out tile -> ~22 MiB aggregate (well under 64 MiB physical)
      v5e :  512^2 out tile -> ~13 MiB aggregate (v5e roofline crossover ~512)
    """
    try:
        kind = jax.devices()[0].device_kind.lower()
    except Exception:  # defensive: unknown backend / mocked devices
        kind = ""
    if "v7" in kind:
        return 768, 768, 1024, 48 * 1024 * 1024
    if "v6" in kind:
        return 1024, 1024, 1024, 64 * 1024 * 1024
    if "v5" in kind:
        return 512, 512, 1024, 48 * 1024 * 1024
    return 512, 512, 512, None  # unknown generation: conservative defaults


def _linear_bias_kernel(x_ref, w_ref, b_ref, o_ref, *, k_rem, compute_dtype):
    """One (tm, tn) output tile; o_ref (f32, K-resident) is the accumulator."""
    k = pl.program_id(2)
    nk = pl.num_programs(2)

    # Cast the freshly DMA'd tiles to the MXU compute dtype (no-op if the
    # caller already streams operands in compute_dtype, or if it's float32).
    x = x_ref[...].astype(compute_dtype)
    w = w_ref[...].astype(compute_dtype)

    if k_rem:
        # Ragged K: zero the out-of-range tail of the last (partial) K block on
        # BOTH operands so unspecified padding can never reach valid outputs
        # (0 * garbage could still be NaN if only one side were masked).
        valid = jnp.where(k == nk - 1, k_rem, x.shape[1])
        x_ids = jax.lax.broadcasted_iota(jnp.int32, x.shape, dimension=1)
        w_ids = jax.lax.broadcasted_iota(jnp.int32, w.shape, dimension=0)
        x = jnp.where(x_ids < valid, x, jnp.zeros_like(x))
        w = jnp.where(w_ids < valid, w, jnp.zeros_like(w))

    part = jnp.dot(x, w, preferred_element_type=jnp.float32)

    @pl.when(k == 0)
    def _():
        # Fold the bias into the first partial product: no zero-init pass and
        # no separate finalize pass over the output tile.
        o_ref[...] = part + b_ref[...]

    @pl.when(k > 0)
    def _():
        o_ref[...] += part


@functools.partial(jax.jit, static_argnames=("tm", "tn", "tk", "compute_dtype"))
def map_linear_forward(x, W, b, *, tm=None, tn=None, tk=None,
                       compute_dtype=jnp.bfloat16):
    """y = x @ W + b with f32 accumulation (MAP_Linear_Layer.forward)."""
    batch, n_input = x.shape
    n_input_w, n_output = W.shape
    assert n_input == n_input_w
    assert b.shape == (n_output,)

    tm_d, tn_d, tk_d, vmem_limit = _generation_tiles()
    tm = tm_d if tm is None else tm
    tn = tn_d if tn is None else tn
    tk = tk_d if tk is None else tk

    # Clamp to the array extents: a block dim equal to the full array dim is
    # always layout-legal; otherwise the defaults are (8, 128) multiples and
    # pl.cdiv grids give (safely handled) partial boundary blocks.
    tm = min(tm, batch)
    tn = min(tn, n_output)
    tk = min(tk, n_input)
    k_rem = n_input % tk

    grid_m = pl.cdiv(batch, tm)
    grid_n = pl.cdiv(n_output, tn)

    # Guarantee a splittable parallel axis (v7x megacore: otherwise a single
    # TensorCore runs the whole kernel).
    if grid_m == 1 and grid_n == 1:
        if n_output >= 256:
            tn = _round_up(pl.cdiv(n_output, 2), 128)
            grid_n = pl.cdiv(n_output, tn)
        elif batch >= 16:
            tm = _round_up(pl.cdiv(batch, 2), 8)
            grid_m = pl.cdiv(batch, tm)

    grid_k = pl.cdiv(n_input, tk)

    # Larger-extent parallel axis outermost; K (reduction) innermost.
    if grid_m >= grid_n:
        grid = (grid_m, grid_n, grid_k)
        x_map = lambda i, j, k: (i, k)
        w_map = lambda i, j, k: (k, j)
        b_map = lambda i, j, k: (0, j)
        o_map = lambda i, j, k: (i, j)
    else:
        grid = (grid_n, grid_m, grid_k)
        x_map = lambda j, i, k: (i, k)
        w_map = lambda j, i, k: (k, j)
        b_map = lambda j, i, k: (0, j)
        o_map = lambda j, i, k: (i, j)

    b2d = b.reshape(1, n_output)

    # Advisory cost estimate (steady-state HBM traffic of this schedule).
    flops = 2 * batch * n_input * n_output
    bytes_accessed = int(
        grid_n * x.size * x.dtype.itemsize
        + grid_m * W.size * W.dtype.itemsize
        + b2d.size * b2d.dtype.itemsize
        + batch * n_output * 4
    )

    kernel = functools.partial(
        _linear_bias_kernel, k_rem=k_rem, compute_dtype=compute_dtype
    )

    # TODO(synk): if profiling ever shows exposed DMA on the K stream (most
    # likely on v7x), add pipeline_mode=pl.Buffered(3) to the x/W BlockSpecs.
    return pl.pallas_call(
        kernel,
        out_shape=jax.ShapeDtypeStruct((batch, n_output), jnp.float32),
        grid=grid,
        in_specs=[
            pl.BlockSpec((tm, tk), x_map),   # x tile (original dtype in HBM)
            pl.BlockSpec((tk, tn), w_map),   # W tile
            pl.BlockSpec((1, tn), b_map),    # bias (resident across inner axes)
        ],
        out_specs=pl.BlockSpec((tm, tn), o_map),
        compiler_params=pltpu.CompilerParams(
            dimension_semantics=("parallel", "parallel", "arbitrary"),
            vmem_limit_bytes=vmem_limit,
        ),
        cost_estimate=pl.CostEstimate(
            flops=flops, transcendentals=0, bytes_accessed=bytes_accessed
        ),
    )(x, W, b2d)


def init_map_linear_params(key, n_input, n_output):
    """Deterministic init matching MAP_Linear_Layer.__init__ distributions."""
    kw, kb = jax.random.split(key)
    W = jax.random.normal(kw, (n_input, n_output), jnp.float32) / jnp.sqrt(
        4.0 * n_output
    )
    b = jax.random.normal(kb, (n_output,), jnp.float32) * 1e-10
    return W, b


if __name__ == "__main__":
    # Small shapes consistent with the module's forward: x is (batch, n_input).
    batch, n_input, n_output = 16, 64, 128

    key = jax.random.PRNGKey(0)
    kx, kp = jax.random.split(key)
    x = jax.random.normal(kx, (batch, n_input), jnp.float32)
    W, b = init_map_linear_params(kp, n_input, n_output)

    # Default (bf16 MXU operands, f32 accumulation).
    out = jax.block_until_ready(map_linear_forward(x, W, b))
    assert out.shape == (batch, n_output)
    assert out.dtype == jnp.float32

    ref_f32 = x @ W + b[None, :]
    ref_bf16 = (
        jnp.dot(x.astype(jnp.bfloat16), W.astype(jnp.bfloat16),
                preferred_element_type=jnp.float32)
        + b[None, :]
    )
    # Tight check vs. the dtype-matched reference, loose vs. full-f32 torch.mm.
    assert jnp.allclose(out, ref_bf16, atol=1e-4, rtol=1e-4)
    assert jnp.allclose(out, ref_f32, atol=5e-2, rtol=5e-2)

    # float32 compute path (parity with the PyTorch f32 layer).
    out_f32 = jax.block_until_ready(
        map_linear_forward(x, W, b, compute_dtype=jnp.float32))
    assert jnp.allclose(out_f32, ref_f32, atol=5e-3, rtol=5e-3)

    # Ragged, non-tile-aligned shape: exercises pl.cdiv grids, the in-kernel
    # K-tail mask, masked boundary output writes and the megacore N split.
    b2, k2, n2 = 24, 200, 384
    x2 = jax.random.normal(jax.random.PRNGKey(1), (b2, k2), jnp.float32)
    W2, bb2 = init_map_linear_params(jax.random.PRNGKey(2), k2, n2)
    out2 = jax.block_until_ready(
        map_linear_forward(x2, W2, bb2, compute_dtype=jnp.float32, tk=128))
    assert out2.shape == (b2, n2)
    assert jnp.allclose(out2, x2 @ W2 + bb2[None, :], atol=1e-2, rtol=1e-2)

    print("KERNEL_OK")
</pallas_src>

<mosaic_0001>
module attributes {stable_mosaic.version = 11 : i64} {
  func.func @_linear_bias_kernel(%arg0: i32, %arg1: i32, %arg2: i32, %arg3: memref<8x64xf32, #tpu.memory_space<vmem>>, %arg4: memref<64x128xf32, #tpu.memory_space<vmem>>, %arg5: memref<1x128xf32, #tpu.memory_space<vmem>>, %arg6: memref<8x128xf32, #tpu.memory_space<vmem>>) attributes {dimension_semantics = [#tpu.dimension_semantics<parallel>, #tpu.dimension_semantics<parallel>, #tpu.dimension_semantics<arbitrary>], iteration_bounds = array<i64: 2, 1, 1>, scalar_prefetch = 0 : i64, scratch_operands = 0 : i64, tpu.core_type = #tpu.core_type<tc>, window_params = [{transform_indices = @transform_0, window_bounds = array<i64: 8, 64>}, {transform_indices = @transform_1, window_bounds = array<i64: 64, 128>}, {transform_indices = @transform_2, window_bounds = array<i64: 1, 128>}, {transform_indices = @transform_3, window_bounds = array<i64: 8, 128>}]} {
    %c0 = arith.constant 0 : index
    %c0_0 = arith.constant 0 : index
    %0 = vector.load %arg3[%c0, %c0_0] : memref<8x64xf32, #tpu.memory_space<vmem>>, vector<8x64xf32>
    %1 = arith.truncf %0 : vector<8x64xf32> to vector<8x64xbf16>
    %c0_1 = arith.constant 0 : index
    %c0_2 = arith.constant 0 : index
    %2 = vector.load %arg4[%c0_1, %c0_2] : memref<64x128xf32, #tpu.memory_space<vmem>>, vector<64x128xf32>
    %3 = arith.truncf %2 : vector<64x128xf32> to vector<64x128xbf16>
    %cst = arith.constant dense<0.000000e+00> : vector<8x128xf32>
    %4 = tpu.matmul %1, %3, %cst {dimension_numbers = #tpu.dot_dimension_numbers<[1], [0], [0], [1], [0, 0, 1, 1], [], []>} : vector<8x64xbf16>, vector<64x128xbf16>, vector<8x128xf32> -> vector<8x128xf32>
    %c0_i32 = arith.constant 0 : i32
    %5 = arith.cmpi eq, %arg2, %c0_i32 : i32
    %6 = arith.extui %5 : i1 to i32
    %c0_i32_3 = arith.constant 0 : i32
    %7 = arith.cmpi ne, %6, %c0_i32_3 : i32
    scf.if %7 {
      %c0_6 = arith.constant 0 : index
      %c0_7 = arith.constant 0 : index
      %11 = vector.load %arg5[%c0_6, %c0_7] : memref<1x128xf32, #tpu.memory_space<vmem>>, vector<1x128xf32>
      %12 = vector.broadcast %11 : vector<1x128xf32> to vector<8x128xf32>
      %13 = arith.addf %4, %12 : vector<8x128xf32>
      %c0_8 = arith.constant 0 : index
      %c0_9 = arith.constant 0 : index
      %14 = vector.load %arg6[%c0_8, %c0_9] : memref<8x128xf32, #tpu.memory_space<vmem>>, vector<8x128xf32>
      tpu.vector_store %arg6[%c0_8, %c0_9], %13 {strides = array<i32>} : memref<8x128xf32, #tpu.memory_space<vmem>>, vector<8x128xf32>,
    } else {
    }
    %c0_i32_4 = arith.constant 0 : i32
    %8 = arith.cmpi sgt, %arg2, %c0_i32_4 : i32
    %9 = arith.extui %8 : i1 to i32
    %c0_i32_5 = arith.constant 0 : i32
    %10 = arith.cmpi ne, %9, %c0_i32_5 : i32
    scf.if %10 {
      %c0_6 = arith.constant 0 : index
      %c0_7 = arith.constant 0 : index
      %11 = vector.load %arg6[%c0_6, %c0_7] : memref<8x128xf32, #tpu.memory_space<vmem>>, vector<8x128xf32>
      %12 = arith.addf %11, %4 : vector<8x128xf32>
      %c0_8 = arith.constant 0 : index
      %c0_9 = arith.constant 0 : index
      %13 = vector.load %arg6[%c0_8, %c0_9] : memref<8x128xf32, #tpu.memory_space<vmem>>, vector<8x128xf32>
      tpu.vector_store %arg6[%c0_8, %c0_9], %12 {strides = array<i32>} : memref<8x128xf32, #tpu.memory_space<vmem>>, vector<8x128xf32>,
    } else {
    }
    return
  }
  func.func @transform_0(%arg0: i32, %arg1: i32, %arg2: i32) -> (i32, i32) {
    %c0_i32 = arith.constant 0 : i32
    return %arg0, %arg2 : i32, i32
  }
  func.func @transform_1(%arg0: i32, %arg1: i32, %arg2: i32) -> (i32, i32) {
    %c0_i32 = arith.constant 0 : i32
    return %arg2, %arg1 : i32, i32
  }
  func.func @transform_2(%arg0: i32, %arg1: i32, %arg2: i32) -> (i32, i32) {
    %c0_i32 = arith.constant 0 : i32
    %c0_i32_0 = arith.constant 0 : i32
    return %c0_i32, %arg1 : i32, i32
  }
  func.func @transform_3(%arg0: i32, %arg1: i32, %arg2: i32) -> (i32, i32) {
    %c0_i32 = arith.constant 0 : i32
    return %arg0, %arg1 : i32, i32
  }
}

</mosaic_0001>

<bundles_post_ra>
// kernel: map_linear_forward.1
= control target key start
LH: loop header
LB: loop body
LE: loop exit
PB: predicated region body
PF: predicated region fallthrough
CT: control target
= control target key end

     0   :  { %8 = vsyncpa [#allocation3], 0  ;;  %s960_s0 = inlined_call_operand.hbm [shape: f32[16,64], index: 0, kind: input, shape index: {}]   ;;  %s961_s1 = inlined_call_operand.hbm [shape: f32[64,128], index: 1, kind: input, shape index: {}]   ;;  %s962_s2 = inlined_call_operand.vmem [shape: f32[1,128], index: 2, kind: input, shape index: {}]   ;;  %s963_s3 = inlined_call_operand.hbm [shape: f32[16,128], index: 3, kind: output, shape index: {}]  }
   0x1   :  { %10 = vsyncpa [#allocation3 + $0x1], 0 }
   0x2   :  { %11 = vsyncpa [#allocation6], 0 }
   0x3   :  { %12 = vsyncpa [#allocation4], 0 }
   0x4   :  { %14 = vsyncpa [#allocation4 + $0x1], 0  ;;  %s739_s12 = smov 0   ;;  %s741_s13 = smov 0  }
   0x5   :  { %s743_s14 = smov 0   ;;  %s745_s15 = smov 0  }
   0x6   :  { %s747_s16 = smov 0   ;;  %s749_s17 = smov 0  }
   0x7 LB: > { %s454_s18 = sadd.s32 4294967295, %s710_s17   ;;  %s455_s19 = sadd.s32 4294967294, %s710_s17   ;;  %s710_s17 = sphi %s749_s17, %s20_s17   ;;  %s706_s16 = sphi %s747_s16, %s987_s16   ;;  %s702_s15 = sphi %s745_s15, %s986_s15   ;;  %s698_s14 = sphi %s743_s14, %s985_s14   ;;  %s694_s13 = sphi %s741_s13, %s984_s13   ;;  %s690_s12 = sphi %s739_s12, %s983_s12  }
   0x8   : > { %p61_p0 = scmp.ne.s32.totalorder %s694_s13, %s690_s12  ;;  %p773_p1 = scmp.eq.s32.totalorder %s454_s18, 0 }
   0x9   : > { %p777_p2 = scmp.eq.s32.totalorder %s454_s18, 1  ;;  %p147_p3 = scmp.eq.s32.totalorder %s455_s19, 1 }
   0xa   : > { %s968_s20 = scalar_select %p773_p1, 1, 0 }
   0xb   : > { %s969_s21 = scalar_select %p777_p2, 1, 0 }
   0xc   : > { %p783_p4 = por %p773_p1, %p61_p0  ;;  %p456_p5 = scmp.ge.s32.totalorder %s710_s17, 1 }
   0xd   : > { %p788_p6 = por %p147_p3, %p61_p0  ;;  %p154_p7 = scmp.lt.s32.totalorder %s710_s17, 3 }
   0xe   : > { %s970_s22 = scalar_select %p783_p4, 1, 0 }
   0xf   : > { %s971_s23 = scalar_select %p788_p6, 1, 0 }
  0x10   : > { %p793_p8 = pnand %p456_p5, %p154_p7  ;;  %s712_s25 = smov [#allocation5]  }
  0x11   : > { %s170_s26 = sshll.u32 %s712_s25, 4  ;;  %s39_s28 = sadd.s32 1, %s706_s16  ;;  %s171_s26 = int_to_ptr.vmem [resolvable:$true] %s170_s26 }
  0x12   : > { %s972_s24 = scalar_select %p793_p8, 1, 0 }
  0x13   : > { %p497_p9 = pneg %p793_p8  ;;  %s566_s4 = scalar_lea.hbm %s961_s1, 1024 }
  0x14   : > { %p567_p12 = scmp.ne.s32.totalorder %s961_s1, %s566_s4  ;;  %p573_p5 = scmp.lt.u32.totalorder %s566_s4, %s961_s1 }
  0x15   : > { %p802_p11 = pnand %p497_p9, %p773_p1 }
  0x17   : > { %p568_p13 = pneg %p802_p11 }
  0x19   : > { %p569_p0 = pnand %p568_p13, %p567_p12 }
  0x1b   : > { %p570_p3 = pneg %p569_p0 }
  0x1d   : > { %p575_p7 = pnand %p573_p5, %p570_p3 }
  0x1f   : > { %578 = shalt.err (!%p575_p7)
}
  0x20   : > { %s579_s9 = scalar_lea.vmem %s171_s26, 1024  ;;  %p587_p1 = scmp.lt.s32.totalorder %s171_s26, %s171_s26 }
  0x21   : > { %p580_p9 = scmp.ne.s32.totalorder %s171_s26, %s579_s9  ;;  %p588_p4 = scmp.lt.s32.totalorder %s579_s9, %s579_s9 }
  0x23   : > { %p582_p10 = pnand %p580_p9, %p568_p13  ;;  %p589_p8 = por %p588_p4, %p587_p1 }
  0x25   : > { %p583_p6 = pneg %p582_p10 }
  0x27   : > { %p590_p2 = pnand %p589_p8, %p583_p6 }
  0x29   : > { %593 = shalt.err (!%p590_p2)
}
  0x2a   : > { %s713_s10 = smov 128   ;;  %s714_s11 = smov 8  }
  0x2b   : > { %500 = dma.hbm_to_vmem [thread:$0]  (!%p802_p11), %s961_s1, 1024, %s171_s26, [#allocation6], %s713_s10, %s713_s10, %s714_s11  }
  0x2c   : > { %p41_p1 = scmp.ge.s32.totalorder %s39_s28, 2  ;;  %s48_s25 = sadd.s32 1, %s698_s14 }
  0x2d   : > { %p55_p2 = scmp.ne.s32.totalorder %s698_s14, %s694_s13  ;;  %p56_p4 = scmp.eq.s32.totalorder %s710_s17, 0 }
  0x2e   : > { %s989_s28 = smov (%p41_p1, %s39_s28), 0  ;;  %p975_p8 = scmp.ne.s32.totalorder %s969_s21, 0 }
  0x2f   : > { %p829_p6 = por %p56_p4, %p55_p2  ;;  %s43_s27 = ssub.s32 %s706_s16, %s989_s28 }
  0x30   : > { %p835_p10 = por %p975_p8, %p55_p2  ;;  %p510_p12 = scmp.lt.s32.totalorder %s710_s17, 2 }
  0x31   : > { %p46_p11 = scmp.eq.s32.totalorder %s43_s27, 0  ;;  %s190_s26 = sand.u32 1, %s698_s14  }
  0x32   : > { %s460_s4 = sshll.u32 %s190_s26, 3  ;;  %s461_s6 = sshll.u32 %s706_s16, 7 }
  0x33   : > { %s844_s5 = scalar_select %p46_p11, %s698_s14, %s48_s25  }
  0x34   : > { %s850_s9 = scalar_lea.hbm %s960_s0, %s461_s6  ;;  %s194_s21 = scalar_lea.vmem [#allocation2], %s460_s4 }
  0x35   : > { %s202_s10 = sshll.u32 %s194_s21, 4  ;;  %p856_p13 = pnand %p510_p12, %p829_p6  ;;  %s852_s10 = int_to_ptr.vmem [resolvable:$true] %s202_s10 }
  0x36   : > { %s191_s18 = scalar_lea.sflag [#allocation3], %s190_s26  ;;  %s594_s19 = scalar_lea.hbm %s850_s9, 128 }
  0x37   : > { %p595_p0 = scmp.ne.s32.totalorder %s850_s9, %s594_s19  ;;  %p596_p3 = pneg %p856_p13 }
  0x38   : > { %s599_s4 = scalar_lea.hbm %s960_s0, 256  ;;  %p600_p9 = scmp.lt.u32.totalorder %s850_s9, %s960_s0 }
  0x39   : > { %p597_p5 = pnand %p596_p3, %p595_p0  ;;  %p601_p1 = scmp.lt.u32.totalorder %s599_s4, %s594_s19 }
  0x3a   : > { %p603_p4 = scmp.lt.u32.totalorder %s594_s19, %s850_s9 }
  0x3b   : > { %p598_p7 = pneg %p597_p5  ;;  %p602_p2 = por %p601_p1, %p600_p9 }
  0x3d   : > { %p604_p6 = por %p603_p4, %p602_p2 }
  0x3f   : > { %p605_p8 = pnand %p604_p6, %p598_p7 }
  0x41   : > { %608 = shalt.err (!%p605_p8)
}
  0x42   : > { %s609_s26 = scalar_lea.vmem %s852_s10, 128  ;;  %s715_s7 = smov [#allocation2]  }
  0x43   : > { %p610_p12 = scmp.ne.s32.totalorder %s852_s10, %s609_s26  ;;  %s614_s8 = sshll.u32 %s715_s7, 4  ;;  %s615_s8 = int_to_ptr.vmem [resolvable:$false] %s614_s8 }
  0x44   : > { %s616_s21 = scalar_lea.vmem %s615_s8, 256  ;;  %p617_p5 = scmp.lt.s32.totalorder %s852_s10, %s615_s8 }
  0x45   : > { %p612_p11 = pnand %p610_p12, %p596_p3  ;;  %p618_p9 = scmp.lt.s32.totalorder %s616_s21, %s609_s26 }
  0x47   : > { %p613_p0 = pneg %p612_p11  ;;  %p619_p1 = por %p618_p9, %p617_p5 }
  0x49   : > { %p620_p2 = pnand %p619_p1, %p613_p0 }
  0x4b   : > { %623 = shalt.err (!%p620_p2)
}
  0x4c   : > { %504 = dma.hbm_to_vmem [thread:$0]  (!%p856_p13), %s850_s9, 128, %s852_s10, %s191_s18  }
  0x4d   : > { %p978_p7 = scmp.ne.s32.totalorder %s972_s24, 0 }
  0x4e   : > { %s888_s19 = sand.u32 (!%p978_p7), 1, %s694_s13   ;;  %p979_p3 = scmp.ne.s32.totalorder (!%p978_p7), %s970_s22, 0 }
  0x4f   : > { %211 = sbr.rel (%p978_p7) target bundleno = 336 (0x150), region = 32  ;;  %s463_s25 = sshll.u32 (!%p978_p7), %s888_s19, 3 }
  0x50   : > { %s214_s27 = scalar_lea.sflag (!%p978_p7), [#allocation3], %s888_s19  ;;  %s217_s4 = scalar_lea.vmem (!%p978_p7), [#allocation2], %s463_s25 }
  0x56   : > { %677 = dma.done.wait (%p979_p3), %s214_s27, 128  }
  0x57   : > { %679 = vsyncadd (%p979_p3), %s214_s27, 4294967168  ;;  %p980_p13 = scmp.ne.s32.totalorder %s968_s20, 0 }
  0x59   : > { %681 = dma.done.wait (%p980_p13), [#allocation6], 1024  }
  0x5a   : > { %683 = vsyncadd (%p980_p13), [#allocation6], 4294966272  ;;  %v716_v0 = vmov 0.0   ;;  %vm717_vm0 = vmmov 0   ;;  %v254_v1 = vld [vmem:[#allocation5] sm:$0xff]  ;;  %v255_v2 = vld [vmem:[#allocation5 + $0x8] sm:$0xff] }
  0x5b   : > { %477 = vmatprep.subr.bf16.mxu0 %v716_v0  ;;  %485 = vmatprep.mubr.msk.bf16.mxu0 %vm717_vm0, %v716_v0  ;;  %v256_v3 = vld [vmem:[#allocation5 + $0x10] sm:$0xff]  ;;  %v262_v4 = vpack.c.bf16 %v255_v2, %v254_v1  ;;  %v257_v5 = vld [vmem:[#allocation5 + $0x18] sm:$0xff]  ;;  %v258_v7 = vld [vmem:[#allocation5 + $0x20] sm:$0xff]  ;;  %vm266_vm1 = vcmask 523264   ;;  %s469_s24 = sshll.u32 %s702_s15, 7  ;;  %s246_s9 = scalar_lea.vmem [#allocation7], %s463_s25 }
  0x5c   : > { %v263_v6 = vpack.c.bf16 %v257_v5, %v256_v3  ;;  %v259_v8 = vld [vmem:[#allocation5 + $0x28] sm:$0xff]  ;;  %v260_v10 = vld [vmem:[#allocation5 + $0x30] sm:$0xff]  ;;  %v261_v11 = vld [vmem:[#allocation5 + $0x38] sm:$0xff]  ;;  %s345_s10 = sshll.u32 %s246_s9, 4  ;;  %s911_s29 = scalar_lea.hbm %s963_s3, %s469_s24  ;;  %s913_s10 = int_to_ptr.vmem [resolvable:$true] %s345_s10 }
  0x5d   : > { %478 = vmatpush3.bf16.msra.mxu0 %v262_v4  ;;  %v264_v9 = vpack.c.bf16 %v259_v8, %v258_v7  ;;  %v265_v12 = vpack.c.bf16 %v261_v11, %v260_v10  ;;  %v252_v13 = vld [vmem:[%s217_s4] sm:$0xff]  ;;  %s331_s15 = scalar_lea.sflag [#allocation4], %s888_s19  ;;  %s624_s6 = scalar_lea.vmem %s913_s10, 128 }
  0x5e   : > { %479 = vmatprep.subr.bf16.mxu0 %v716_v0  ;;  %v253_v14 = vpack.c.bf16 %v252_v13, %v252_v13  ;;  %v467_v15 = vld [vmem:[%s962_s2] ss:$0 sm:$0xff]  ;;  %p625_p4 = scmp.ne.s32.totalorder %s913_s10, %s624_s6  ;;  %s718_s26 = smov [#allocation7]  }
  0x5f   : > { %s628_s7 = sshll.u32 %s718_s26, 4  ;;  %s629_s7 = int_to_ptr.vmem [resolvable:$false] %s628_s7 }
  0x60   : > { %p626_p6 = pnand %p625_p4, %p835_p10  ;;  %s630_s8 = scalar_lea.vmem %s629_s7, 256 }
  0x61   : > { %480 = vmatpush3.bf16.msra.mxu0 %v263_v6  ;;  %p631_p12 = scmp.lt.s32.totalorder %s913_s10, %s629_s7  ;;  %p632_p11 = scmp.lt.s32.totalorder %s630_s8, %s624_s6 }
  0x62   : > { %481 = vmatprep.subr.bf16.mxu0 %v716_v0  ;;  %p627_p8 = pneg %p626_p6 }
  0x63   : > { %p633_p0 = por %p632_p11, %p631_p12 }
  0x65   : > { %482 = vmatpush3.bf16.msra.mxu0 %v264_v9  ;;  %p634_p5 = pnand %p633_p0, %p627_p8 }
  0x66   : > { %483 = vmatprep.subr.bf16.mxu0 %v716_v0 }
  0x69   : > { %484 = vmatpush3.bf16.msra.mxu0 %v265_v12 }
  0x6c   : > { %486 = vmatmul.mubr.msk.bf16.vlgmr.msra.gmra.mrb[0].mxu0 %vm266_vm1, %v253_v14 }
 0x13f   : > { %v304_v16 = vpop.f32.mrb[0].mxu0 }
 0x140   : > { %v321_v17 = vadd.f32 %v467_v15, %v304_v16  ;;  %v487_v18 = vpop.f32.mrb[1].mxu0 }
 0x141   : > { %v307_v19 = vpop.f32.mrb[2].mxu0 }
 0x142   : > { %322 = vst [vmem:[%s246_s9] sm:$0xff] %v321_v17  ;;  %v488_v20 = vpop.f32.mrb[3].mxu0 }
 0x143   : > { %637 = shalt.err (!%p634_p5)
}
 0x144   : > { %s638_s21 = scalar_lea.hbm %s911_s29, 128  ;;  %s642_s27 = scalar_lea.hbm %s963_s3, 256 }
 0x145   : > { %p639_p9 = scmp.ne.s32.totalorder %s911_s29, %s638_s21  ;;  %p643_p7 = scmp.lt.u32.totalorder %s911_s29, %s963_s3 }
 0x146   : > { %p644_p3 = scmp.lt.u32.totalorder %s642_s27, %s638_s21  ;;  %p646_p4 = scmp.lt.u32.totalorder %s638_s21, %s911_s29 }
 0x147   : > { %p640_p1 = pnand %p639_p9, %p835_p10 }
 0x148   : > { %p645_p13 = por %p644_p3, %p643_p7 }
 0x149   : > { %p641_p2 = pneg %p640_p1 }
 0x14a   : > { %p647_p6 = por %p646_p4, %p645_p13 }
 0x14c   : > { %p648_p8 = pnand %p647_p6, %p641_p2 }
 0x14e   : > { %651 = shalt.err (!%p648_p8)
}
 0x14f   : > { %495 = dma.vmem_to_hbm [thread:$0]  (%p835_p10), %s913_s10, 128, %s911_s29, %s331_s15  }
 0x150 PF: > { %s357_s22 = sand.u32 1, %s690_s12   ;;  %p981_p12 = scmp.ne.s32.totalorder %s971_s23, 0 }
 0x151   : > { %p982_p11 = scmp.ge.s32.totalorder %s710_s17, 2  ;;  %s358_s24 = scalar_lea.sflag [#allocation4], %s357_s22 }
 0x153   : > { %p506_p0 = pnand %p982_p11, %p981_p12 }
 0x155   : > { %685 = dma.done.wait (!%p506_p0), %s358_s24, 128  }
 0x156   : > { %687 = vsyncadd (!%p506_p0), %s358_s24, 4294967168  ;;  %s20_s17 = sadd.s32 1, %s710_s17   ;;  %s983_s12 = smov %s694_s13 }
 0x157   : > { %p17_p5 = scmp.ge.s32.totalorder %s20_s17, 4   ;;  %s984_s13 = smov %s698_s14 }
 0x158   : > { %s985_s14 = smov %s844_s5  ;;  %s986_s15 = smov %s706_s16 }
 0x159   : > { %s987_s16 = smov %s989_s28  ;;  %19 = sbr.rel (!%p17_p5) target bundleno = 7 (0x7), region = 93 }
 0x160   :  { %363 = vsyncpa [#allocation3], 1 }
 0x161   :  { %365 = vsyncpa [#allocation3 + $0x1], 1 }
 0x162   :  { %366 = vsyncpa [#allocation6], 1 }
 0x163   :  { %367 = vsyncpa [#allocation4], 1 }
 0x164   :  { %369 = vsyncpa [#allocation4 + $0x1], 1 }

</bundles_post_ra>
